<compile_context>
chip_gen: v7x
topology: tpu7x:2x2x1
jax: 0.10.0
libtpu: 0.0.40
codegen_flags: <defaults>
</compile_context>

<pallas_src>
import functools
import math

import jax
import jax.numpy as jnp
from jax import lax
from jax.experimental import pallas as pl
from jax.experimental.pallas import tpu as pltpu


# --------------------------------------------------------------------------
# Kernel 1: fused QKV projection GEMM
# --------------------------------------------------------------------------
def _qkv_proj_kernel(x_ref, w_ref, b_ref, out_ref, *, heads_per_group, head_dim):
    # x_ref:   (1, Ts, H)       hidden-state row tile for one batch element
    # w_ref:   (1, H, G*Dh)     fused weights for G consecutive projection heads
    # b_ref:   (1, 1, G*Dh)     fused bias
    # out_ref: (G, 1, Ts, Dh)   rows of the (3*Nh, B, S, Dh) qkv tensor
    acc = jnp.dot(x_ref[0], w_ref[0], preferred_element_type=jnp.float32)
    acc = (acc + b_ref[0]).astype(out_ref.dtype)
    # Static unroll: split the wide-N result into per-head slabs (in VMEM,
    # avoids any HBM transpose later).
    for j in range(heads_per_group):
        out_ref[j, 0] = acc[:, j * head_dim:(j + 1) * head_dim]


# --------------------------------------------------------------------------
# Kernel 2: flash-style attention (online softmax over KV tiles)
# --------------------------------------------------------------------------
def _flash_attn_kernel(q_ref, k_ref, v_ref, mask_ref, out_ref,
                       m_sc, l_sc, acc_sc, *, num_heads, fp32_cast_query_key):
    # q_ref:    (Nh, 1, Tq, Dh)  all query heads for this (batch, q-tile); the
    #                            block index ignores the KV axis -> resident.
    # k_ref:    (Nh, 1, Tk, Dh)  all key heads for this KV tile
    # v_ref:    (Nh, 1, Tk, Dh)
    # mask_ref: (1, 1, Tk)       additive row mask
    # out_ref:  (1, Tq, Nh, Dh)  lane-dense context block, resident across KV
    # scratch:  m_sc/l_sc (Nh, Tq, 1), acc_sc (Nh, Tq, Dh) -- online softmax state
    ki = pl.program_id(2)

    @pl.when(ki == 0)
    def _init():
        m_sc[...] = jnp.full(m_sc.shape, -jnp.inf, dtype=m_sc.dtype)
        l_sc[...] = jnp.zeros(l_sc.shape, dtype=l_sc.dtype)
        acc_sc[...] = jnp.zeros(acc_sc.shape, dtype=acc_sc.dtype)

    mask = mask_ref[0].astype(jnp.float32)              # (1, Tk)

    for h in range(num_heads):                          # static unroll over heads
        q = q_ref[h, 0]                                 # (Tq, Dh)
        k = k_ref[h, 0]                                 # (Tk, Dh)
        v = v_ref[h, 0]                                 # (Tk, Dh)
        if fp32_cast_query_key and q.dtype != jnp.float32:
            q = q.astype(jnp.float32)
            k = k.astype(jnp.float32)
        # Contract head_dim of both operands directly -- no explicit k.T
        # (avoids XLU transpose work).  Query scaling is already in q.
        s = lax.dot_general(q, k, (((1,), (1,)), ((), ())),
                            preferred_element_type=jnp.float32)    # (Tq, Tk)
        s = s + mask

        m_prev = m_sc[h]                                # (Tq, 1)
        m_new = jnp.maximum(m_prev, jnp.max(s, axis=-1, keepdims=True))
        alpha = jnp.exp(m_prev - m_new)
        p = jnp.exp(s - m_new)
        l_sc[h] = alpha * l_sc[h] + jnp.sum(p, axis=-1, keepdims=True)
        acc_sc[h] = alpha * acc_sc[h] + lax.dot_general(
            p.astype(v.dtype), v, (((1,), (0,)), ((), ())),
            preferred_element_type=jnp.float32)
        m_sc[h] = m_new

    @pl.when(ki == pl.num_programs(2) - 1)
    def _finalize():
        for h in range(num_heads):
            # Normalize after the PV matmul: S*Dh multiplies, not S*S divides.
            inv = pl.reciprocal(l_sc[h], approx=False)
            out_ref[0, :, h, :] = (acc_sc[h] * inv).astype(out_ref.dtype)


# --------------------------------------------------------------------------
# Wrapper helpers
# --------------------------------------------------------------------------
def _pick_tile(n, target):
    """Largest tile <= target that divides n and stays (8,128)-friendly."""
    if n <= target:
        return n
    for t in range(target, 7, -1):
        if n % t == 0 and t % 8 == 0:
            return t
    return n  # fall back to the full (untiled) dimension


def _heads_per_group(num_heads, head_dim, target_lanes=512):
    """Heads per projection matmul so the MXU N dimension is wide (<= target)."""
    g = 1
    for cand in range(1, num_heads + 1):
        if num_heads % cand == 0 and cand * head_dim <= target_lanes:
            g = cand
    return g


def _vmem_limit(block_bytes, scratch_bytes=0):
    est = 3 * int(block_bytes) + int(scratch_bytes) + (4 << 20)
    return int(min(max(est, 16 << 20), 64 << 20))   # respects v7x 64 MiB VMEM


# --------------------------------------------------------------------------
# Public wrapper: AlexaTMSelfAttention.forward (self-attention path)
# --------------------------------------------------------------------------
def alexatm_self_attention(hidden_states, params, num_attention_heads,
                           attention_mask=None, fp32_cast_query_key=True):
    B, S, H = hidden_states.shape
    Nh = num_attention_heads
    assert H % Nh == 0
    Dh = H // Nh
    dtype = hidden_states.dtype
    itemsize = jnp.dtype(dtype).itemsize
    scaling = 1.0 / math.sqrt(Dh)

    # ---- one-time weight prep (batch independent) --------------------------
    # torch nn.Linear: y = x @ W.T + b.  Fold the 1/sqrt(Dh) query scaling
    # into W_q / b_q so the kernels never touch (S, S)-sized scaling.
    def per_head(w_t):                       # (H, H) -> (Nh, H, Dh)
        return jnp.transpose(w_t.reshape(H, Nh, Dh), (1, 0, 2))

    w_all = jnp.concatenate(
        [per_head(params["wq"].T * scaling),
         per_head(params["wk"].T),
         per_head(params["wv"].T)], axis=0)                       # (3*Nh, H, Dh)
    b_all = jnp.concatenate(
        [params["bq"] * scaling, params["bk"], params["bv"]],
        axis=0).reshape(3 * Nh, Dh)

    G = _heads_per_group(Nh, Dh)             # heads per projection matmul
    NG = (3 * Nh) // G
    w_grouped = (w_all.reshape(NG, G, H, Dh).transpose(0, 2, 1, 3)
                 .reshape(NG, H, G * Dh)).astype(dtype)
    b_grouped = b_all.reshape(NG, 1, G * Dh).astype(dtype)

    # ---- Kernel 1: fused QKV projection ------------------------------------
    Ts = _pick_tile(S, 256)
    proj_blocks = ((Ts * H + H * G * Dh + G * Dh + G * Ts * Dh) * itemsize
                   + Ts * G * Dh * 4)
    qkv_heads = pl.pallas_call(
        functools.partial(_qkv_proj_kernel, heads_per_group=G, head_dim=Dh),
        out_shape=jax.ShapeDtypeStruct((3 * Nh, B, S, Dh), dtype),
        grid_spec=pltpu.PrefetchScalarGridSpec(
            num_scalar_prefetch=0,
            grid=(NG, B, S // Ts),        # weight-group axis outermost:
            in_specs=[                    # each weight block is fetched once.
                pl.BlockSpec((1, Ts, H), lambda g, b, si: (b, si, 0)),
                pl.BlockSpec((1, H, G * Dh), lambda g, b, si: (g, 0, 0)),
                pl.BlockSpec((1, 1, G * Dh), lambda g, b, si: (g, 0, 0)),
            ],
            out_specs=pl.BlockSpec((G, 1, Ts, Dh), lambda g, b, si: (g, b, si, 0)),
        ),
        compiler_params=pltpu.CompilerParams(
            dimension_semantics=("parallel", "parallel", "parallel"),
            vmem_limit_bytes=_vmem_limit(proj_blocks)),
        cost_estimate=pl.CostEstimate(
            flops=int(2 * B * S * H * 3 * H),
            transcendentals=0,
            bytes_accessed=int((B * S * H + 3 * H * H + 3 * H
                                + 3 * B * S * H) * itemsize)),
    )(hidden_states, w_grouped, b_grouped)

    # ---- Attention mask: keep a row vector (B, 1, S) -- never (B, S, S) ----
    if attention_mask is None:
        mask = jnp.zeros((B, 1, S), dtype=jnp.float32)
    else:
        m = attention_mask
        if m.ndim == 4 and m.shape[2] == 1:
            m = m.reshape(B, 1, S)
        elif m.ndim == 2:
            m = m.reshape(B, 1, S)
        else:
            # TODO(synk): general (B, 1, S, S) masks (e.g. causal) need a 2-D
            # mask BlockSpec; only HF-style additive row masks are handled.
            raise NotImplementedError("only (B,1,1,S) / (B,S) additive masks")
        mask = m.astype(jnp.float32)

    # ---- Kernel 2: flash attention ------------------------------------------
    Tq = _pick_tile(S, 128)
    Tk = _pick_tile(S, 256)
    attn_blocks = ((Nh * Tq * Dh + 2 * Nh * Tk * Dh + Tq * Nh * Dh) * itemsize
                   + Tk * 4)
    attn_scratch = (2 * Nh * Tq * 128 + Nh * Tq * Dh) * 4
    ctx = pl.pallas_call(
        functools.partial(_flash_attn_kernel, num_heads=Nh,
                          fp32_cast_query_key=bool(fp32_cast_query_key)),
        out_shape=jax.ShapeDtypeStruct((B, S, Nh, Dh), dtype),
        grid_spec=pltpu.PrefetchScalarGridSpec(
            num_scalar_prefetch=0,
            grid=(B, S // Tq, S // Tk),
            in_specs=[
                # qkv_heads rows [0, Nh) = Q, [Nh, 2Nh) = K, [2Nh, 3Nh) = V.
                pl.BlockSpec((Nh, 1, Tq, Dh), lambda b, qi, ki: (0, b, qi, 0)),
                pl.BlockSpec((Nh, 1, Tk, Dh), lambda b, qi, ki: (1, b, ki, 0)),
                pl.BlockSpec((Nh, 1, Tk, Dh), lambda b, qi, ki: (2, b, ki, 0)),
                pl.BlockSpec((1, 1, Tk), lambda b, qi, ki: (b, 0, ki)),
            ],
            out_specs=pl.BlockSpec((1, Tq, Nh, Dh),
                                   lambda b, qi, ki: (b, qi, 0, 0)),
            scratch_shapes=[pltpu.VMEM((Nh, Tq, 1), jnp.float32),
                            pltpu.VMEM((Nh, Tq, 1), jnp.float32),
                            pltpu.VMEM((Nh, Tq, Dh), jnp.float32)],
        ),
        compiler_params=pltpu.CompilerParams(
            dimension_semantics=("parallel", "parallel", "arbitrary"),
            vmem_limit_bytes=_vmem_limit(attn_blocks, attn_scratch)),
        cost_estimate=pl.CostEstimate(
            flops=int(4 * B * Nh * S * S * Dh),
            transcendentals=int(B * Nh * S * S),
            bytes_accessed=int(4 * B * S * H * itemsize + B * S * 4)),
    )(qkv_heads, qkv_heads, qkv_heads, mask)

    # (B, S, Nh, Dh) is row-major-contiguous as (B, S, H): free view, no
    # transpose pass through HBM.
    # TODO(synk): dropout / head_mask / output_attentions / cross-attention
    # (encoder_hidden_states) are not implemented (inference self-attn path).
    return ctx.reshape(B, S, H)


# --------------------------------------------------------------------------
# Pure-JAX mirror of the PyTorch forward (sanity check)
# --------------------------------------------------------------------------
def _reference(hidden_states, params, num_attention_heads,
               attention_mask=None, fp32_cast_query_key=True):
    B, S, H = hidden_states.shape
    Nh = num_attention_heads
    Dh = H // Nh
    scaling = 1.0 / math.sqrt(Dh)

    def lin(x, w, b):
        return x @ w.T + b

    def split(x):
        return jnp.transpose(x.reshape(B, S, Nh, Dh), (0, 2, 1, 3))

    q = split(lin(hidden_states, params["wq"], params["bq"]))
    k = split(lin(hidden_states, params["wk"], params["bk"]))
    v = split(lin(hidden_states, params["wv"], params["bv"]))
    if fp32_cast_query_key:
        scores = jnp.einsum("bhqd,bhkd->bhqk",
                            q.astype(jnp.float32), k.astype(jnp.float32))
    else:
        scores = jnp.einsum("bhqd,bhkd->bhqk", q, k)
    scores = scores * scaling
    if attention_mask is not None:
        scores = scores + attention_mask
    probs = jax.nn.softmax(scores.astype(hidden_states.dtype), axis=-1)
    ctx = jnp.einsum("bhqk,bhkd->bhqd", probs, v)
    return jnp.transpose(ctx, (0, 2, 1, 3)).reshape(B, S, H)


if __name__ == "__main__":
    B, S, H, Nh = 2, 8, 32, 4

    key = jax.random.PRNGKey(0)
    ks = jax.random.split(key, 8)
    hidden = jax.random.normal(ks[0], (B, S, H), dtype=jnp.float32)

    std = 1.0 / math.sqrt(H)
    params = {
        "wq": jax.random.normal(ks[1], (H, H), dtype=jnp.float32) * std,
        "wk": jax.random.normal(ks[2], (H, H), dtype=jnp.float32) * std,
        "wv": jax.random.normal(ks[3], (H, H), dtype=jnp.float32) * std,
        "bq": jax.random.normal(ks[4], (H,), dtype=jnp.float32) * 0.02,
        "bk": jax.random.normal(ks[5], (H,), dtype=jnp.float32) * 0.02,
        "bv": jax.random.normal(ks[6], (H,), dtype=jnp.float32) * 0.02,
    }

    # HF-style additive extended mask: (B, 1, 1, S); 0 keep, -1e9 drop.
    keep = (jax.random.uniform(ks[7], (B, 1, 1, S)) > 0.2).astype(jnp.float32)
    attn_mask = (1.0 - keep) * -1e9

    out = alexatm_self_attention(hidden, params, Nh,
                                 attention_mask=attn_mask,
                                 fp32_cast_query_key=True)
    out = jax.block_until_ready(out)

    ref = _reference(hidden, params, Nh, attention_mask=attn_mask,
                     fp32_cast_query_key=True)
    assert out.shape == (B, S, H)
    assert jnp.allclose(out, ref, atol=2e-5, rtol=2e-5), \
        float(jnp.max(jnp.abs(out - ref)))

    print("KERNEL_OK")
</pallas_src>

<mosaic_0001>
module attributes {stable_mosaic.version = 11 : i64} {
  func.func @_qkv_proj_kernel(%arg0: i32, %arg1: i32, %arg2: i32, %arg3: memref<1x8x32xf32, #tpu.memory_space<vmem>>, %arg4: memref<1x32x32xf32, #tpu.memory_space<vmem>>, %arg5: memref<1x1x32xf32, #tpu.memory_space<vmem>>, %arg6: memref<4x1x8x8xf32, #tpu.memory_space<vmem>>) attributes {dimension_semantics = [#tpu.dimension_semantics<parallel>, #tpu.dimension_semantics<parallel>, #tpu.dimension_semantics<parallel>], iteration_bounds = array<i64: 3, 2, 1>, scalar_prefetch = 0 : i64, scratch_operands = 0 : i64, tpu.core_type = #tpu.core_type<tc>, window_params = [{transform_indices = @transform_0, window_bounds = array<i64: 1, 8, 32>}, {transform_indices = @transform_1, window_bounds = array<i64: 1, 32, 32>}, {transform_indices = @transform_2, window_bounds = array<i64: 1, 1, 32>}, {transform_indices = @transform_3, window_bounds = array<i64: 4, 1, 8, 8>}]} {
    %c0 = arith.constant 0 : index
    %c0_0 = arith.constant 0 : index
    %c0_1 = arith.constant 0 : index
    %0 = vector.load %arg3[%c0, %c0_0, %c0_1] : memref<1x8x32xf32, #tpu.memory_space<vmem>>, vector<1x8x32xf32>
    %1 = vector.shape_cast %0 : vector<1x8x32xf32> to vector<8x32xf32>
    %c0_2 = arith.constant 0 : index
    %c0_3 = arith.constant 0 : index
    %c0_4 = arith.constant 0 : index
    %2 = vector.load %arg4[%c0_2, %c0_3, %c0_4] : memref<1x32x32xf32, #tpu.memory_space<vmem>>, vector<1x32x32xf32>
    %3 = vector.shape_cast %2 : vector<1x32x32xf32> to vector<32x32xf32>
    %cst = arith.constant dense<0.000000e+00> : vector<8x32xf32>
    %4 = tpu.matmul %1, %3, %cst {dimension_numbers = #tpu.dot_dimension_numbers<[1], [0], [0], [1], [0, 0, 1, 1], [], []>} : vector<8x32xf32>, vector<32x32xf32>, vector<8x32xf32> -> vector<8x32xf32>
    %c0_5 = arith.constant 0 : index
    %c0_6 = arith.constant 0 : index
    %c0_7 = arith.constant 0 : index
    %5 = vector.load %arg5[%c0_5, %c0_6, %c0_7] : memref<1x1x32xf32, #tpu.memory_space<vmem>>, vector<1x1x32xf32>
    %6 = vector.shape_cast %5 : vector<1x1x32xf32> to vector<1x32xf32>
    %7 = vector.broadcast %6 : vector<1x32xf32> to vector<8x32xf32>
    %8 = arith.addf %4, %7 : vector<8x32xf32>
    %9 = vector.extract_strided_slice %8 {offsets = [0, 0], sizes = [8, 8], strides = [1, 1]} : vector<8x32xf32> to vector<8x8xf32>
    %c0_8 = arith.constant 0 : index
    %c0_9 = arith.constant 0 : index
    %c0_10 = arith.constant 0 : index
    %c0_11 = arith.constant 0 : index
    %10 = vector.load %arg6[%c0_8, %c0_9, %c0_10, %c0_11] : memref<4x1x8x8xf32, #tpu.memory_space<vmem>>, vector<1x1x8x8xf32>
    %11 = vector.shape_cast %10 : vector<1x1x8x8xf32> to vector<8x8xf32>
    %12 = vector.shape_cast %9 : vector<8x8xf32> to vector<1x1x8x8xf32>
    tpu.vector_store %arg6[%c0_8, %c0_9, %c0_10, %c0_11], %12 {strides = array<i32>} : memref<4x1x8x8xf32, #tpu.memory_space<vmem>>, vector<1x1x8x8xf32>,
    %13 = vector.extract_strided_slice %8 {offsets = [0, 8], sizes = [8, 8], strides = [1, 1]} : vector<8x32xf32> to vector<8x8xf32>
    %c1 = arith.constant 1 : index
    %c0_12 = arith.constant 0 : index
    %c0_13 = arith.constant 0 : index
    %c0_14 = arith.constant 0 : index
    %14 = vector.load %arg6[%c1, %c0_12, %c0_13, %c0_14] : memref<4x1x8x8xf32, #tpu.memory_space<vmem>>, vector<1x1x8x8xf32>
    %15 = vector.shape_cast %14 : vector<1x1x8x8xf32> to vector<8x8xf32>
    %16 = vector.shape_cast %13 : vector<8x8xf32> to vector<1x1x8x8xf32>
    tpu.vector_store %arg6[%c1, %c0_12, %c0_13, %c0_14], %16 {strides = array<i32>} : memref<4x1x8x8xf32, #tpu.memory_space<vmem>>, vector<1x1x8x8xf32>,
    %17 = vector.extract_strided_slice %8 {offsets = [0, 16], sizes = [8, 8], strides = [1, 1]} : vector<8x32xf32> to vector<8x8xf32>
    %c2 = arith.constant 2 : index
    %c0_15 = arith.constant 0 : index
    %c0_16 = arith.constant 0 : index
    %c0_17 = arith.constant 0 : index
    %18 = vector.load %arg6[%c2, %c0_15, %c0_16, %c0_17] : memref<4x1x8x8xf32, #tpu.memory_space<vmem>>, vector<1x1x8x8xf32>
    %19 = vector.shape_cast %18 : vector<1x1x8x8xf32> to vector<8x8xf32>
    %20 = vector.shape_cast %17 : vector<8x8xf32> to vector<1x1x8x8xf32>
    tpu.vector_store %arg6[%c2, %c0_15, %c0_16, %c0_17], %20 {strides = array<i32>} : memref<4x1x8x8xf32, #tpu.memory_space<vmem>>, vector<1x1x8x8xf32>,
    %21 = vector.extract_strided_slice %8 {offsets = [0, 24], sizes = [8, 8], strides = [1, 1]} : vector<8x32xf32> to vector<8x8xf32>
    %c3 = arith.constant 3 : index
    %c0_18 = arith.constant 0 : index
    %c0_19 = arith.constant 0 : index
    %c0_20 = arith.constant 0 : index
    %22 = vector.load %arg6[%c3, %c0_18, %c0_19, %c0_20] : memref<4x1x8x8xf32, #tpu.memory_space<vmem>>, vector<1x1x8x8xf32>
    %23 = vector.shape_cast %22 : vector<1x1x8x8xf32> to vector<8x8xf32>
    %24 = vector.shape_cast %21 : vector<8x8xf32> to vector<1x1x8x8xf32>
    tpu.vector_store %arg6[%c3, %c0_18, %c0_19, %c0_20], %24 {strides = array<i32>} : memref<4x1x8x8xf32, #tpu.memory_space<vmem>>, vector<1x1x8x8xf32>,
    return
  }
  func.func @transform_0(%arg0: i32, %arg1: i32, %arg2: i32) -> (i32, i32, i32) {
    %c0_i32 = arith.constant 0 : i32
    %c0_i32_0 = arith.constant 0 : i32
    return %arg1, %arg2, %c0_i32 : i32, i32, i32
  }
  func.func @transform_1(%arg0: i32, %arg1: i32, %arg2: i32) -> (i32, i32, i32) {
    %c0_i32 = arith.constant 0 : i32
    %c0_i32_0 = arith.constant 0 : i32
    %c0_i32_1 = arith.constant 0 : i32
    return %arg0, %c0_i32, %c0_i32_0 : i32, i32, i32
  }
  func.func @transform_2(%arg0: i32, %arg1: i32, %arg2: i32) -> (i32, i32, i32) {
    %c0_i32 = arith.constant 0 : i32
    %c0_i32_0 = arith.constant 0 : i32
    %c0_i32_1 = arith.constant 0 : i32
    return %arg0, %c0_i32, %c0_i32_0 : i32, i32, i32
  }
  func.func @transform_3(%arg0: i32, %arg1: i32, %arg2: i32) -> (i32, i32, i32, i32) {
    %c0_i32 = arith.constant 0 : i32
    %c0_i32_0 = arith.constant 0 : i32
    return %arg0, %arg1, %arg2, %c0_i32 : i32, i32, i32, i32
  }
}

</mosaic_0001>

<bundles_post_ra>
// kernel: tpu_custom_call.1
= control target key start
LH: loop header
LB: loop body
LE: loop exit
PB: predicated region body
PF: predicated region fallthrough
CT: control target
= control target key end

     0   :  { %s1203_s0 = inlined_call_operand.hbm [shape: f32[2,8,32], index: 0, kind: input, shape index: {}]   ;;  %s1204_s1 = inlined_call_operand.hbm [shape: f32[3,32,32], index: 1, kind: input, shape index: {}]   ;;  %s1205_s2 = inlined_call_operand.vmem [shape: f32[3,1,32], index: 2, kind: input, shape index: {}]   ;;  %s1206_s3 = inlined_call_operand.vmem [shape: f32[12,2,8,8], index: 3, kind: output, shape index: {}]  }
   0x1   :  { %1213 = sst [smem:[#allocation14_spill]] %s1203_s0 }
   0x2   :  { %8 = vsyncpa [#allocation3], 0 }
   0x3   :  { %10 = vsyncpa [#allocation3 + $0x1], 0 }
   0x4   :  { %11 = vsyncpa [#allocation5], 0 }
   0x5   :  { %13 = vsyncpa [#allocation5 + $0x1], 0  ;;  %s910_s12 = smov 0   ;;  %s912_s13 = smov 0  }
   0x6   :  { %s914_s14 = smov 0   ;;  %s916_s15 = smov 0  }
   0x7   :  { %s918_s16 = smov 0   ;;  %s920_s17 = smov 0  }
   0x8   :  { %s922_s18 = smov 0   ;;  %s924_s19 = smov 0  }
   0x9   :  { %s926_s20 = smov 0   ;;  %s928_s21 = smov 0  }
   0xa   :  { %s930_s22 = smov 0   ;;  %s932_s23 = smov 0  }
   0xb   :  { %s934_s24 = smov 0  }
   0xc LB: > { %1214 = sst [smem:[#allocation9_spill]] %s870_s22  ;;  %s536_s25 = sadd.s32 4294967295, %s878_s24   ;;  %s878_s24 = sphi %s934_s24, %s19_s24   ;;  %s874_s23 = sphi %s932_s23, %s1238_s23   ;;  %s870_s22 = sphi %s930_s22, %s1237_s22   ;;  %s866_s21 = sphi %s928_s21, %s1249_s21   ;;  %s862_s20 = sphi %s926_s20, %s1248_s20   ;;  %s858_s19 = sphi %s924_s19, %s1247_s19   ;;  %s854_s18 = sphi %s922_s18, %s1246_s18   ;;  %s850_s17 = sphi %s920_s17, %s1245_s17   ;;  %s846_s16 = sphi %s918_s16, %s1244_s16   ;;  %s842_s15 = sphi %s916_s15, %s1243_s15   ;;  %s838_s14 = sphi %s914_s14, %s1242_s14   ;;  %s834_s13 = sphi %s912_s13, %s1241_s13   ;;  %s830_s12 = sphi %s910_s12, %s1240_s12  }
   0xd   : > { %1215 = sst [smem:[#allocation10_spill]] %s874_s23  ;;  %s34_s26 = sadd.s32 1, %s870_s22 }
   0xe   : > { %p36_p0 = scmp.ge.s32.totalorder %s34_s26, 2  ;;  %s38_s27 = sadd.s32 1, %s874_s23 }
   0xf   : > { %s47_s28 = sadd.s32 1, %s858_s19  ;;  %p54_p1 = scmp.ne.s32.totalorder %s858_s19, %s854_s18 }
  0x10   : > { %s1251_s26 = smov (%p36_p0, %s34_s26), 0  ;;  %s1253_s27 = smov (!%p36_p0, %s38_s27), %s874_s23 }
  0x11   : > { %1216 = sst [smem:[#allocation11_spill]] %s1251_s26  ;;  %s42_s29 = ssub.s32 %s870_s22, %s1251_s26 }
  0x12   : > { %p55_p2 = scmp.eq.s32.totalorder %s878_s24, 0  ;;  %p40_p3 = scmp.ge.s32.totalorder %s1253_s27, 3 }
  0x13   : > { %p45_p4 = scmp.eq.s32.totalorder %s42_s29, 0  ;;  %p60_p6 = scmp.ne.s32.totalorder %s854_s18, %s850_s17 }
  0x14   : > { %p987_p5 = por %p55_p2, %p54_p1  ;;  %s1255_s27 = smov (%p40_p3, %s1253_s27), 0 }
  0x15   : > { %1218 = sst [smem:[#allocation12_spill]] %s1255_s27  ;;  %p61_p7 = scmp.eq.s32.totalorder %s536_s25, 0 }
  0x16   : > { %s995_s4 = scalar_select %p45_p4, %s858_s19, %s47_s28  }
  0x17   : > { %s70_s5 = ssub.s32 %s874_s23, %s1255_s27  ;;  %s73_s6 = sadd.s32 1, %s846_s16 }
  0x18   : > { %1219 = sst [smem:[#allocation13_spill]] %s995_s4  ;;  %p71_p8 = scmp.eq.s32.totalorder %s70_s5, 0 }
  0x19   : > { %p1002_p9 = por %p61_p7, %p60_p6  ;;  %p80_p10 = scmp.ne.s32.totalorder %s846_s16, %s842_s15 }
  0x1a   : > { %s1009_s8 = scalar_select %p71_p8, %s846_s16, %s73_s6  }
  0x1b   : > { %s1220_s7 = scalar_select %p1002_p9, 1, 0 }
  0x1c   : > { %p1013_p11 = por %p80_p10, %p55_p2  ;;  %p86_p12 = scmp.ne.s32.totalorder %s842_s15, %s838_s14 }
  0x1d   : > { %s124_s10 = sor.u32 %s70_s5, %s42_s29  ;;  %s129_s11 = sadd.s32 1, %s834_s13 }
  0x1e   : > { %p1020_p13 = por %p86_p12, %p61_p7  ;;  %p127_p0 = scmp.eq.s32.totalorder %s124_s10, 0 }
  0x1f   : > { %p139_p1 = scmp.ne.s32.totalorder %s834_s13, %s830_s12  ;;  %p140_p3 = scmp.eq.s32.totalorder %s536_s25, 5 }
  0x20   : > { %s1222_s17 = scalar_select %p1020_p13, 1, 0 }
  0x21   : > { %s1029_s28 = scalar_select %p127_p0, %s834_s13, %s129_s11  }
  0x22   : > { %p1031_p2 = por %p140_p3, %p139_p1  ;;  %p595_p4 = scmp.lt.s32.totalorder %s878_s24, 6 }
  0x23   : > { %s166_s14 = sand.u32 1, %s858_s19   ;;  %s541_s5 = sshll.u32 %s870_s22, 7 }
  0x24   : > { %s1223_s6 = scalar_select %p1031_p2, 1, 0 }
  0x25   : > { %s540_s29 = sshll.u32 %s166_s14, 3  ;;  %s1224_s0 = sld [smem:[#allocation14_spill]] }
  0x26   : > { %s170_s10 = scalar_lea.vmem [#allocation2], %s540_s29  ;;  %p1047_p6 = pnand %p595_p4, %p987_p5 }
  0x27   : > { %s178_s25 = sshll.u32 %s170_s10, 4  ;;  %p1053_p7 = pnand %p595_p4, %p1013_p11  ;;  %s1043_s25 = int_to_ptr.vmem [resolvable:$true] %s178_s25 }
  0x28   : > { %s167_s27 = scalar_lea.sflag [#allocation3], %s166_s14  ;;  %p710_p0 = pneg %p1047_p6 }
  0x2b   : > { %s1041_s4 = scalar_lea.hbm %s1224_s0, %s541_s5  ;;  %s713_s9 = scalar_lea.hbm %s1224_s0, 256 }
  0x2c   : > { %s708_s29 = scalar_lea.hbm %s1041_s4, 128  ;;  %p714_p11 = scmp.lt.u32.totalorder %s1041_s4, %s1224_s0 }
  0x2d   : > { %p709_p12 = scmp.ne.s32.totalorder %s1041_s4, %s708_s29  ;;  %p715_p3 = scmp.lt.u32.totalorder %s713_s9, %s708_s29 }
  0x2e   : > { %p717_p8 = scmp.lt.u32.totalorder %s708_s29, %s1041_s4 }
  0x2f   : > { %p711_p5 = pnand %p710_p0, %p709_p12  ;;  %p716_p4 = por %p715_p3, %p714_p11 }
  0x31   : > { %p712_p1 = pneg %p711_p5  ;;  %p718_p10 = por %p717_p8, %p716_p4 }
  0x33   : > { %p719_p2 = pnand %p718_p10, %p712_p1 }
  0x35   : > { %722 = shalt.err (!%p719_p2)
}
  0x36   : > { %s723_s14 = scalar_lea.vmem %s1043_s25, 128  ;;  %s880_s30 = smov [#allocation2]  }
  0x37   : > { %p724_p12 = scmp.ne.s32.totalorder %s1043_s25, %s723_s14  ;;  %s728_s5 = sshll.u32 %s880_s30, 4  ;;  %s729_s5 = int_to_ptr.vmem [resolvable:$false] %s728_s5 }
  0x38   : > { %s730_s22 = scalar_lea.vmem %s729_s5, 256  ;;  %p731_p9 = scmp.lt.s32.totalorder %s1043_s25, %s729_s5 }
  0x39   : > { %p726_p5 = pnand %p724_p12, %p710_p0  ;;  %p732_p11 = scmp.lt.s32.totalorder %s730_s22, %s723_s14 }
  0x3b   : > { %p727_p13 = pneg %p726_p5  ;;  %p733_p3 = por %p732_p11, %p731_p9 }
  0x3d   : > { %p734_p8 = pnand %p733_p3, %p727_p13 }
  0x3f   : > { %737 = shalt.err (!%p734_p8)
}
  0x40   : > { %591 = dma.hbm_to_vmem [thread:$0]  (!%p1047_p6), %s1041_s4, 128, %s1043_s25, %s167_s27  }
  0x41   : > { %p1227_p2 = scmp.lt.s32.totalorder %s878_s24, 7  ;;  %p1228_p10 = scmp.ge.s32.totalorder %s878_s24, 1 }
  0x42   : > { %s185_s9 = sand.u32 1, %s846_s16   ;;  %s560_s10 = sshll.u32 %s874_s23, 9 }
  0x43   : > { %p1088_p0 = pnand %p1228_p10, %p1227_p2  ;;  %s542_s14 = sshll.u32 %s185_s9, 5 }
  0x44   : > { %s1097_s5 = scalar_lea.hbm %s1204_s1, %s560_s10  ;;  %s189_s22 = scalar_lea.vmem [#allocation4], %s542_s14 }
  0x45   : > { %s196_s4 = sshll.u32 %s189_s22, 4  ;;  %s1101_s25 = scalar_lea.sflag [#allocation5], %s185_s9  ;;  %s1099_s4 = int_to_ptr.vmem [resolvable:$true] %s196_s4 }
  0x46   : > { %s738_s27 = scalar_lea.hbm %s1097_s5, 512  ;;  %p740_p13 = pneg %p1053_p7 }
  0x47   : > { %p739_p9 = scmp.ne.s32.totalorder %s1097_s5, %s738_s27  ;;  %s743_s11 = scalar_lea.hbm %s1204_s1, 1536 }
  0x48   : > { %p744_p4 = scmp.lt.u32.totalorder %s1097_s5, %s1204_s1  ;;  %p745_p12 = scmp.lt.u32.totalorder %s743_s11, %s738_s27 }
  0x49   : > { %p741_p6 = pnand %p740_p13, %p739_p9  ;;  %p747_p11 = scmp.lt.u32.totalorder %s738_s27, %s1097_s5 }
  0x4a   : > { %p746_p5 = por %p745_p12, %p744_p4 }
  0x4b   : > { %p742_p1 = pneg %p741_p6 }
  0x4c   : > { %p748_p3 = por %p747_p11, %p746_p5 }
  0x4e   : > { %p749_p8 = pnand %p748_p3, %p742_p1 }
  0x50   : > { %752 = shalt.err (!%p749_p8)
}
  0x51   : > { %s753_s9 = scalar_lea.vmem %s1099_s4, 512  ;;  %s881_s14 = smov [#allocation4]  }
  0x52   : > { %p754_p2 = scmp.ne.s32.totalorder %s1099_s4, %s753_s9  ;;  %s758_s22 = sshll.u32 %s881_s14, 4  ;;  %s759_s22 = int_to_ptr.vmem [resolvable:$false] %s758_s22 }
  0x53   : > { %s760_s0 = scalar_lea.vmem %s759_s22, 1024  ;;  %p761_p6 = scmp.lt.s32.totalorder %s1099_s4, %s759_s22 }
  0x54   : > { %p756_p10 = pnand %p754_p2, %p740_p13  ;;  %p762_p4 = scmp.lt.s32.totalorder %s760_s0, %s753_s9 }
  0x56   : > { %p757_p9 = pneg %p756_p10  ;;  %p763_p12 = por %p762_p4, %p761_p6 }
  0x58   : > { %p764_p5 = pnand %p763_p12, %p757_p9 }
  0x5a   : > { %767 = shalt.err (!%p764_p5)
}
  0x5b   : > { %s882_s23 = smov 128   ;;  %s883_s27 = smov 8  }
  0x5c   : > { %594 = dma.hbm_to_vmem [thread:$0]  (!%p1053_p7), %s1097_s5, 512, %s1099_s4, %s1101_s25, %s882_s23, %s882_s23, %s883_s27  }
  0x5d   : > { %214 = sbr.rel (%p1088_p0) target bundleno = 457 (0x1c9), region = 32  ;;  %s216_s10 = sand.u32 (!%p1088_p0), 1, %s854_s18  }
  0x5e   : > { %s546_s30 = sshll.u32 (!%p1088_p0), %s216_s10, 3  ;;  %s217_s11 = scalar_lea.sflag (!%p1088_p0), [#allocation3], %s216_s10 }
  0x5f   : > { %s220_s9 = scalar_lea.vmem (!%p1088_p0), [#allocation2], %s546_s30  ;;  %p1230_p13 = scmp.ne.s32.totalorder (!%p1088_p0), %s1220_s7, 0 }
  0x64   : > { %821 = dma.done.wait (%p1230_p13), %s217_s11, 128  }
  0x65   : > { %823 = vsyncadd (%p1230_p13), %s217_s11, 4294967168  ;;  %s225_s14 = sand.u32 1, %s842_s15   ;;  %p1231_p7 = scmp.ne.s32.totalorder %s1222_s17, 0 }
  0x66   : > { %s547_s22 = sshll.u32 %s225_s14, 5  ;;  %s226_s26 = scalar_lea.sflag [#allocation5], %s225_s14 }
  0x67   : > { %s229_s5 = scalar_lea.vmem [#allocation4], %s547_s22 }
  0x68   : > { %825 = dma.done.wait (%p1231_p7), %s226_s26, 512  }
  0x69   : > { %827 = vsyncadd (%p1231_p7), %s226_s26, 4294966784  ;;  %v884_v0 = vmov 0.0|0.0   ;;  %vm885_vm0 = vmmov 0   ;;  %v886_v1 = vmov 0.0   ;;  %v264_v2 = vld [vmem:[%s229_s5] sm:$0xff]  ;;  %v265_v3 = vld [vmem:[%s229_s5 + $0x8] sm:$0xff] }
  0x6a   : > { %578 = vmatprep.subr.bf16.mxu0 %v884_v0  ;;  %575 = vmatprep.mubr.msk.f32.mxu0 %vm885_vm0, %v886_v1  ;;  %v266_v4 = vld [vmem:[%s229_s5 + $0x10] sm:$0xff]  ;;  %v579_v5 = vpack.c.bf16 %v265_v3, %v264_v2  ;;  %v267_v6 = vld [vmem:[%s229_s5 + $0x18] sm:$0xff]  ;;  %vm275_vm1 = vcmask 261120   ;;  %p259_p0 = scmp.lt.s32.totalorder %s866_s21, 2  ;;  %s256_s17 = sand.u32 1, %s830_s12   ;;  %vm349_vm2 = vcmask 64512  }
  0x6b   : > { %v582_v7 = vpack.c.bf16 %v267_v6, %v266_v4  ;;  %v263_v8 = vld [vmem:[%s220_s9] sm:$0xff]  ;;  %s548_s0 = sshll.u32 %s256_s17, 5  ;;  %s887_s23 = smov 104  }
  0x6c   : > { %580 = vmatpush3.bf16.msra.mxu0 %v579_v5  ;;  %s260_s7 = scalar_select %p259_p0, %s866_s21, 2 }
  0x6d   : > { %581 = vmatprep.subr.bf16.mxu0 %v884_v0  ;;  %s888_s27 = smov 120   ;;  %s258_s10 = scalar_lea.vmem [#allocation6], %s548_s0 }
  0x6e   : > { %s261_s25 = scalar_lea.vmem %s1205_s2, %s260_s7  ;;  %s889_s30 = smov 112  }
  0x6f   : > { %v549_v9 = vld [vmem:[%s261_s25] ss:$0 sm:$0xff]  ;;  %p1232_p1 = scmp.ne.s32.totalorder %s1223_s6, 0 }
  0x70   : > { %583 = vmatpush3.bf16.msra.mxu0 %v582_v7  ;;  %s561_s12 = sshll.u32 (%p1232_p1), %s866_s21, 3 }
  0x71   : > { %s377_s11 = sadd.s32 (%p1232_p1), %s862_s20, %s561_s12 }
  0x72   : > { %s557_s9 = sshll.u32 (%p1232_p1), %s377_s11, 3 }
  0x73   : > { %576 = vmatmul.mubr.msk.f32.vlgmr.msra.gmra.mrb[0].mxu0 %vm275_vm1, %v263_v8  ;;  %s379_s26 = scalar_lea.vmem (%p1232_p1), %s1206_s3, %s557_s9 }
 0x146   : > { %v345_v10 = vpop.f32.mrb[0].mxu0 }
 0x147   : > { %v346_v11 = vadd.f32 %v549_v9, %v345_v10  ;;  %v577_v12 = vpop.f32.mrb[1].mxu0 }
 0x149   : > { %362 = vrot.lane.b32.xlu1 %v346_v11, %s887_s23  ;;  %352 = vrot.lane.b32.xlu0 %v346_v11, %s888_s27  ;;  %350 = vst.msk [vmem:[%s258_s10] sm:$0xff] %vm349_vm2, %v346_v11 }
 0x14d   : > { %357 = vrot.lane.b32.xlu0 %v346_v11, %s889_s30 }
 0x150   : > { %v413_v16 = vld [vmem:[%s258_s10] sm:$0xff] (%p1232_p1) }
 0x151   : > { %414 = vst [vmem:[%s379_s26] sm:$0xff] (%p1232_p1), %v413_v16 }
 0x1ba   : > { %373 = sbr.rel (!%p1232_p1) target bundleno = 457 (0x1c9), region = 44 }
 0x1bb   : > { %v363_v13 = vpop.permute.xlu1 %362  ;;  %v353_v14 = vpop.permute.xlu0 %352 }
 0x1bc   : > { %553 = vst.msk [vmem:[%s258_s10 + $0x18] sm:$0xff] %vm349_vm2, %v363_v13  ;;  %551 = vst.msk [vmem:[%s258_s10 + $0x8] sm:$0xff] %vm349_vm2, %v353_v14 }
 0x1bf   : > { %v358_v15 = vpop.permute.xlu0 %357 }
 0x1c0   : > { %552 = vst.msk [vmem:[%s258_s10 + $0x10] sm:$0xff] %vm349_vm2, %v358_v15 }
 0x1c3   : > { %v415_v17 = vld [vmem:[%s258_s10 + $0x8] sm:$0xff]  ;;  %v419_v19 = vld [vmem:[%s258_s10 + $0x18] sm:$0xff] }
 0x1c4   : > { %416 = vst [vmem:[%s379_s26 + $0x10] sm:$0xff] %v415_v17  ;;  %420 = vst [vmem:[%s379_s26 + $0x30] sm:$0xff] %v419_v19 }
 0x1c7   : > { %v417_v18 = vld [vmem:[%s258_s10 + $0x10] sm:$0xff] }
 0x1c8   : > { %418 = vst [vmem:[%s379_s26 + $0x20] sm:$0xff] %v417_v18 }
 0x1c9 PF: > { %s19_s24 = sadd.s32 1, %s878_s24   ;;  %s1234_s20 = sld [smem:[#allocation13_spill]] }
 0x1ca   : > { %p1159_p11 = scmp.ge.s32.totalorder %s19_s24, 8   ;;  %s1235_s6 = sld [smem:[#allocation9_spill]] }
 0x1cb   : > { %s1236_s5 = sld [smem:[#allocation10_spill]]  ;;  %s1237_s22 = sld [smem:[#allocation11_spill]] }
 0x1cc   : > { %s1238_s23 = sld [smem:[#allocation12_spill]]  ;;  %s1240_s12 = smov %s834_s13 }
 0x1cd   : > { %s1241_s13 = smov %s1029_s28  ;;  %s1242_s14 = smov %s842_s15 }
 0x1ce   : > { %s1243_s15 = smov %s846_s16  ;;  %s1244_s16 = smov %s1009_s8 }
 0x1cf   : > { %s1245_s17 = smov %s854_s18  ;;  %s1246_s18 = smov %s858_s19 }
 0x1d0   : > { %s1247_s19 = smov %s1234_s20  ;;  %s1248_s20 = smov %s1235_s6 }
 0x1d1   : > { %s1249_s21 = smov %s1236_s5  ;;  %18 = sbr.rel (!%p1159_p11) target bundleno = 12 (0xc), region = 129 }
 0x1d8   :  { %436 = vsyncpa [#allocation3], 1 }
 0x1d9   :  { %438 = vsyncpa [#allocation3 + $0x1], 1 }
 0x1da   :  { %439 = vsyncpa [#allocation5], 1 }
 0x1db   :  { %441 = vsyncpa [#allocation5 + $0x1], 1 }

</bundles_post_ra>
